<compile_context>
chip_gen: v6e
topology: v6e:2x2x1
jax: 0.10.0
libtpu: 0.0.40
codegen_flags: <defaults>
</compile_context>

<pallas_src>
import math

import jax
import jax.numpy as jnp
from jax.experimental import pallas as pl
from jax.experimental.pallas import tpu as pltpu


def _round_up(n, m):
    return ((n + m - 1) // m) * m


def _lff_kernel(x_ref, b_ref, w_sin_ref, w_cos_ref, w_x_ref, bias_ref, o_ref):
    x = x_ref[...].astype(jnp.float32)

    # Fourier projection on the MXU (2*pi already folded into B); keep f32 so
    # the trig arguments have full phase precision.
    proj = jnp.dot(x, b_ref[...], preferred_element_type=jnp.float32)

    mm_dtype = w_sin_ref.dtype  # bf16 (default) or f32 — decided in the wrapper.

    # sin branch: compute, cast, consume immediately (one trig temp live).
    out = jnp.dot(jnp.sin(proj).astype(mm_dtype), w_sin_ref[...],
                  preferred_element_type=jnp.float32)
    # cos branch, accumulated into the same f32 accumulator.
    out = out + jnp.dot(jnp.cos(proj).astype(mm_dtype), w_cos_ref[...],
                        preferred_element_type=jnp.float32)
    # x contribution (K = input_size, tiny): also on the MXU so it overlaps
    # with the VALU-bound trig work; kept f32 since x is not bounded in [-1,1].
    out = out + jnp.dot(x, w_x_ref[...], preferred_element_type=jnp.float32)

    out = out + bias_ref[...]
    o_ref[...] = out.astype(o_ref.dtype)


def lff_forward(x, B, W, bias, *, tile_m=1024, matmul_dtype=jnp.bfloat16):
    """x: (batch, input_size); B: (input_size, F); W: (2F + input_size, E); bias: (E,)."""
    batch, input_size = x.shape
    fourier_dim = B.shape[1]
    embed_dim = W.shape[1]
    assert W.shape[0] == 2 * fourier_dim + input_size

    # --- weight prep (cheap, outside the kernel; hoisted under jit) ---------
    b_scaled = (B * (2.0 * math.pi)).astype(jnp.float32)
    w_sin = W[:fourier_dim].astype(matmul_dtype)                    # (F, E)
    w_cos = W[fourier_dim:2 * fourier_dim].astype(matmul_dtype)     # (F, E)
    w_x = W[2 * fourier_dim:].astype(jnp.float32)                   # (input_size, E)
    bias2d = bias.reshape(1, embed_dim).astype(jnp.float32)

    # --- batch tiling: >= 2 grid steps when possible (v7x 2-TC), no padding -
    half = _round_up(pl.cdiv(batch, 2), 8)
    tile_m_eff = max(8, min(int(tile_m), half))
    if tile_m_eff >= batch:
        tile_m_eff = batch  # single full-extent block (legal for any batch)
    grid = (pl.cdiv(batch, tile_m_eff),)

    out = pl.pallas_call(
        _lff_kernel,
        out_shape=jax.ShapeDtypeStruct((batch, embed_dim), x.dtype),
        grid_spec=pltpu.PrefetchScalarGridSpec(
            num_scalar_prefetch=0,
            grid=grid,
            in_specs=[
                pl.BlockSpec((tile_m_eff, input_size), lambda i: (i, 0)),
                pl.BlockSpec((input_size, fourier_dim), lambda i: (0, 0)),
                pl.BlockSpec((fourier_dim, embed_dim), lambda i: (0, 0)),
                pl.BlockSpec((fourier_dim, embed_dim), lambda i: (0, 0)),
                pl.BlockSpec((input_size, embed_dim), lambda i: (0, 0)),
                pl.BlockSpec((1, embed_dim), lambda i: (0, 0)),
            ],
            out_specs=pl.BlockSpec((tile_m_eff, embed_dim), lambda i: (i, 0)),
        ),
        compiler_params=pltpu.CompilerParams(
            dimension_semantics=("parallel",)),
    )(x, b_scaled, w_sin, w_cos, w_x, bias2d)

    return out


def lff_reference(x, B, W, bias):
    proj = jnp.matmul(x, B) * (2.0 * math.pi)
    ff = jnp.concatenate([jnp.sin(proj), jnp.cos(proj), x], axis=-1)
    return jnp.matmul(ff, W) + bias


if __name__ == "__main__":
    # Module hyperparameters (small, consistent with LFF.__init__ defaults).
    input_size = 4
    sigma = 0.01
    fourier_dim = 256
    embed_dim = 72
    batch = 16

    key = jax.random.PRNGKey(0)
    k_x, k_b, k_w, k_bias = jax.random.split(key, 4)

    # Deterministic parameter init (shapes from LFF.__init__).
    x = jax.random.normal(k_x, (batch, input_size), dtype=jnp.float32)
    B = sigma * jax.random.normal(k_b, (input_size, fourier_dim), dtype=jnp.float32)
    fan_in = 2 * fourier_dim + input_size
    bound = 1.0 / math.sqrt(fan_in)
    # Linear weight kept as (in_features, out_features) == torch weight.T.
    W = jax.random.uniform(k_w, (fan_in, embed_dim), dtype=jnp.float32,
                           minval=-bound, maxval=bound)
    bias = jax.random.uniform(k_bias, (embed_dim,), dtype=jnp.float32,
                              minval=-bound, maxval=bound)

    ref = lff_reference(x, B, W, bias)

    # Exact-semantics check (f32 weights in the big dots).
    out_f32 = jax.block_until_ready(
        lff_forward(x, B, W, bias, matmul_dtype=jnp.float32))
    assert out_f32.shape == (batch, embed_dim)
    assert jnp.allclose(out_f32, ref, atol=1e-5, rtol=1e-5), "f32 path mismatch"

    # Default fast path (bf16 operands on the dominant dots, f32 accumulation).
    out_bf16 = jax.block_until_ready(lff_forward(x, B, W, bias))
    assert out_bf16.shape == (batch, embed_dim)
    assert jnp.allclose(out_bf16, ref, atol=5e-2, rtol=5e-2), "bf16 path mismatch"

    print("KERNEL_OK")
</pallas_src>

<mosaic_0001>
module attributes {stable_mosaic.version = 11 : i64} {
  func.func @_lff_kernel(%arg0: i32, %arg1: memref<8x4xf32, #tpu.memory_space<vmem>>, %arg2: memref<4x256xf32, #tpu.memory_space<vmem>>, %arg3: memref<256x72xf32, #tpu.memory_space<vmem>>, %arg4: memref<256x72xf32, #tpu.memory_space<vmem>>, %arg5: memref<4x72xf32, #tpu.memory_space<vmem>>, %arg6: memref<1x72xf32, #tpu.memory_space<vmem>>, %arg7: memref<8x72xf32, #tpu.memory_space<vmem>>) attributes {dimension_semantics = [#tpu.dimension_semantics<parallel>], iteration_bounds = array<i64: 2>, scalar_prefetch = 0 : i64, scratch_operands = 0 : i64, tpu.core_type = #tpu.core_type<tc>, window_params = [{transform_indices = @transform_0, window_bounds = array<i64: 8, 4>}, {pipeline_mode = #tpu.pipeline_mode<synchronous>, transform_indices = @transform_1, window_bounds = array<i64: 4, 256>}, {pipeline_mode = #tpu.pipeline_mode<synchronous>, transform_indices = @transform_2, window_bounds = array<i64: 256, 72>}, {pipeline_mode = #tpu.pipeline_mode<synchronous>, transform_indices = @transform_3, window_bounds = array<i64: 256, 72>}, {pipeline_mode = #tpu.pipeline_mode<synchronous>, transform_indices = @transform_4, window_bounds = array<i64: 4, 72>}, {pipeline_mode = #tpu.pipeline_mode<synchronous>, transform_indices = @transform_5, window_bounds = array<i64: 1, 72>}, {transform_indices = @transform_6, window_bounds = array<i64: 8, 72>}]} {
    %c0 = arith.constant 0 : index
    %c0_0 = arith.constant 0 : index
    %0 = vector.load %arg1[%c0, %c0_0] : memref<8x4xf32, #tpu.memory_space<vmem>>, vector<8x4xf32>
    %c0_1 = arith.constant 0 : index
    %c0_2 = arith.constant 0 : index
    %1 = vector.load %arg2[%c0_1, %c0_2] : memref<4x256xf32, #tpu.memory_space<vmem>>, vector<4x256xf32>
    %cst = arith.constant dense<0.000000e+00> : vector<8x256xf32>
    %2 = tpu.matmul %0, %1, %cst {dimension_numbers = #tpu.dot_dimension_numbers<[1], [0], [0], [1], [0, 0, 1, 1], [], []>} : vector<8x4xf32>, vector<4x256xf32>, vector<8x256xf32> -> vector<8x256xf32>
    %3 = math.sin %2 : vector<8x256xf32>
    %c0_3 = arith.constant 0 : index
    %c0_4 = arith.constant 0 : index
    %4 = vector.load %arg3[%c0_3, %c0_4] : memref<256x72xf32, #tpu.memory_space<vmem>>, vector<256x72xf32>
    %cst_5 = arith.constant dense<0.000000e+00> : vector<8x72xf32>
    %5 = tpu.matmul %3, %4, %cst_5 {dimension_numbers = #tpu.dot_dimension_numbers<[1], [0], [0], [1], [0, 0, 1, 1], [], []>} : vector<8x256xf32>, vector<256x72xf32>, vector<8x72xf32> -> vector<8x72xf32>
    %6 = math.cos %2 : vector<8x256xf32>
    %c0_6 = arith.constant 0 : index
    %c0_7 = arith.constant 0 : index
    %7 = vector.load %arg4[%c0_6, %c0_7] : memref<256x72xf32, #tpu.memory_space<vmem>>, vector<256x72xf32>
    %cst_8 = arith.constant dense<0.000000e+00> : vector<8x72xf32>
    %8 = tpu.matmul %6, %7, %cst_8 {dimension_numbers = #tpu.dot_dimension_numbers<[1], [0], [0], [1], [0, 0, 1, 1], [], []>} : vector<8x256xf32>, vector<256x72xf32>, vector<8x72xf32> -> vector<8x72xf32>
    %9 = arith.addf %5, %8 : vector<8x72xf32>
    %c0_9 = arith.constant 0 : index
    %c0_10 = arith.constant 0 : index
    %10 = vector.load %arg5[%c0_9, %c0_10] : memref<4x72xf32, #tpu.memory_space<vmem>>, vector<4x72xf32>
    %cst_11 = arith.constant dense<0.000000e+00> : vector<8x72xf32>
    %11 = tpu.matmul %0, %10, %cst_11 {dimension_numbers = #tpu.dot_dimension_numbers<[1], [0], [0], [1], [0, 0, 1, 1], [], []>} : vector<8x4xf32>, vector<4x72xf32>, vector<8x72xf32> -> vector<8x72xf32>
    %12 = arith.addf %9, %11 : vector<8x72xf32>
    %c0_12 = arith.constant 0 : index
    %c0_13 = arith.constant 0 : index
    %13 = vector.load %arg6[%c0_12, %c0_13] : memref<1x72xf32, #tpu.memory_space<vmem>>, vector<1x72xf32>
    %14 = vector.broadcast %13 : vector<1x72xf32> to vector<8x72xf32>
    %15 = arith.addf %12, %14 : vector<8x72xf32>
    %c0_14 = arith.constant 0 : index
    %c0_15 = arith.constant 0 : index
    %16 = vector.load %arg7[%c0_14, %c0_15] : memref<8x72xf32, #tpu.memory_space<vmem>>, vector<8x72xf32>
    tpu.vector_store %arg7[%c0_14, %c0_15], %15 {strides = array<i32>} : memref<8x72xf32, #tpu.memory_space<vmem>>, vector<8x72xf32>,
    return
  }
  func.func @transform_0(%arg0: i32) -> (i32, i32) {
    %c0_i32 = arith.constant 0 : i32
    %c0_i32_0 = arith.constant 0 : i32
    return %arg0, %c0_i32 : i32, i32
  }
  func.func @transform_1(%arg0: i32) -> (i32, i32) {
    %c0_i32 = arith.constant 0 : i32
    %c0_i32_0 = arith.constant 0 : i32
    %c0_i32_1 = arith.constant 0 : i32
    return %c0_i32, %c0_i32_0 : i32, i32
  }
  func.func @transform_2(%arg0: i32) -> (i32, i32) {
    %c0_i32 = arith.constant 0 : i32
    %c0_i32_0 = arith.constant 0 : i32
    %c0_i32_1 = arith.constant 0 : i32
    return %c0_i32, %c0_i32_0 : i32, i32
  }
  func.func @transform_3(%arg0: i32) -> (i32, i32) {
    %c0_i32 = arith.constant 0 : i32
    %c0_i32_0 = arith.constant 0 : i32
    %c0_i32_1 = arith.constant 0 : i32
    return %c0_i32, %c0_i32_0 : i32, i32
  }
  func.func @transform_4(%arg0: i32) -> (i32, i32) {
    %c0_i32 = arith.constant 0 : i32
    %c0_i32_0 = arith.constant 0 : i32
    %c0_i32_1 = arith.constant 0 : i32
    return %c0_i32, %c0_i32_0 : i32, i32
  }
  func.func @transform_5(%arg0: i32) -> (i32, i32) {
    %c0_i32 = arith.constant 0 : i32
    %c0_i32_0 = arith.constant 0 : i32
    %c0_i32_1 = arith.constant 0 : i32
    return %c0_i32, %c0_i32_0 : i32, i32
  }
  func.func @transform_6(%arg0: i32) -> (i32, i32) {
    %c0_i32 = arith.constant 0 : i32
    %c0_i32_0 = arith.constant 0 : i32
    return %arg0, %c0_i32 : i32, i32
  }
}

</mosaic_0001>

<bundles_post_ra>
// kernel: tpu_custom_call.1
= control target key start
LH: loop header
LB: loop body
LE: loop exit
PB: predicated region body
PF: predicated region fallthrough
CT: control target
= control target key end

     0   :  { %11 = vsyncpa [#allocation3], 0  ;;  %s1767_s0 = inlined_call_operand.vmem [shape: f32[16,4], index: 0, kind: input, shape index: {}]   ;;  %s1768_s1 = inlined_call_operand.vmem [shape: f32[4,256], index: 1, kind: input, shape index: {}]   ;;  %s1769_s2 = inlined_call_operand.vmem [shape: f32[256,72], index: 2, kind: input, shape index: {}]   ;;  %s1770_s3 = inlined_call_operand.vmem [shape: f32[256,72], index: 3, kind: input, shape index: {}]   ;;  %s1771_s4 = inlined_call_operand.vmem [shape: f32[4,72], index: 4, kind: input, shape index: {}]   ;;  %s1772_s5 = inlined_call_operand.vmem [shape: f32[1,72], index: 5, kind: input, shape index: {}]   ;;  %s1773_s6 = inlined_call_operand.hbm [shape: f32[16,72], index: 6, kind: output, shape index: {}]  }
   0x1   :  { %13 = vsyncpa [#allocation3 + $0x1], 0  ;;  %s1386_s21 = smov 0   ;;  %s1388_s22 = smov 0  }
   0x2   :  { %s1390_s23 = smov 0   ;;  %s1392_s24 = smov 0  }
   0x3 LB: > { %s1407_s25 = sadd.s32 4294967295, %s1340_s24   ;;  %s1107_s26 = sadd.s32 4294967294, %s1340_s24   ;;  %s1340_s24 = sphi %s1392_s24, %s1781_s24   ;;  %s1336_s23 = sphi %s1390_s23, %s1780_s23   ;;  %s1332_s22 = sphi %s1388_s22, %s1779_s22   ;;  %s1328_s21 = sphi %s1386_s21, %s1778_s21  }
   0x4   : > { %s1411_s27 = sadd.s32 1, %s1340_s24   ;;  %s157_s28 = sadd.s32 1, %s1336_s23 }
   0x5   : > { %s154_s29 = ssub.s32 %s1340_s24, %s1411_s27  ;;  %p167_p0 = scmp.ne.s32.totalorder %s1336_s23, %s1332_s22 }
   0x6   : > { %p155_p1 = scmp.eq.s32.totalorder %s154_s29, 0  ;;  %p168_p2 = scmp.eq.s32.totalorder %s1407_s25, 1 }
   0x7   : > { %p173_p3 = scmp.ne.s32.totalorder %s1332_s22, %s1328_s21  ;;  %p174_p4 = scmp.eq.s32.totalorder %s1107_s26, 1 }
   0x8   : > { %s1422_s30 = scalar_select %p155_p1, %s1336_s23, %s157_s28  }
   0x9   : > { %p1424_p5 = por %p168_p2, %p167_p0  ;;  %p1428_p6 = por %p174_p4, %p173_p3 }
   0xa   : > { %p1110_p7 = scmp.ge.s32.totalorder %s1340_s24, 1  ;;  %p214_p8 = scmp.lt.s32.totalorder %s1340_s24, 3 }
   0xc   : > { %p215_p9 = pnand %p1110_p7, %p214_p8 }
   0xd   : > { %p243_p10 = scmp.lt.s32.totalorder (!%p215_p9), %s1407_s25, 1  ;;  %s1350_s29 = smov (!%p215_p9), [#allocation2]  }
   0xe   : > { %218 = sbr.rel (%p215_p9) target bundleno = 526 (0x20e), region = 44  ;;  %s1284_s9 = sshll.u32 (!%p215_p9), %s1350_s29, 4  ;;  %s1285_s9 = int_to_ptr.vmem [resolvable:$false] %s1284_s9 }
  0x13   : > { %v248_v0 = vld [vmem:[%s1768_s1] sm:$0xff]  ;;  %vm255_vm0 = vcmask 1043456   ;;  %v1342_v2 = vmov 0.0   ;;  %s244_s11 = scalar_select %p243_p10, %s1407_s25, 1  ;;  %vm251_vm1 = vcmask 31744   ;;  %v808_v4 = vld [vmem:[%s1770_s3 + $0xf8] sm:$0xff] }
  0x14   : > { %v250_v1 = vcombine.high %v248_v0, %v248_v0  ;;  %324 = vmatprep.mubr.f32.mxu0 %v1342_v2  ;;  %v570_v5 = vld [vmem:[%s1769_s2 + $0xf8] sm:$0xff]  ;;  %1139 = vmatprep.subr.mxu1 %v808_v4  ;;  %v807_v8 = vld [vmem:[%s1770_s3 + $0xf0] sm:$0xff]  ;;  %v806_v12 = vld [vmem:[%s1770_s3 + $0xe8] sm:$0xff] }
  0x15   : > { %s1112_s12 = sshll.u32 %s244_s11, 3  ;;  %v792_v6 = vld [vmem:[%s1770_s3 + $0x78] sm:$0xff]  ;;  %v569_v9 = vld [vmem:[%s1769_s2 + $0xf0] sm:$0xff]  ;;  %v568_v13 = vld [vmem:[%s1769_s2 + $0xe8] sm:$0xff]  ;;  %s240_s11 = sand.u32 1, %s1332_s22  }
  0x16   : > { %1113 = vmatprep.subr.msk.mxu0 %vm255_vm0, %v250_v1  ;;  %s246_s15 = scalar_lea.vmem %s1767_s0, %s1112_s12  ;;  %v554_v7 = vld [vmem:[%s1769_s2 + $0x78] sm:$0xff]  ;;  %1140 = vmatpush3.msra.mxu1 %v792_v6  ;;  %v791_v10 = vld [vmem:[%s1770_s3 + $0x70] sm:$0xff]  ;;  %v790_v14 = vld [vmem:[%s1770_s3 + $0x68] sm:$0xff]  ;;  %s1111_s12 = sshll.u32 %s240_s11, 3 }
  0x17   : > { %1114 = vmatpush1.msk.msra.mxu0 %vm255_vm0, %v248_v0  ;;  %v1445_v3 = vld [vmem:[%s246_s15] sm:$0xff]  ;;  %1141 = vmatprep.subr.mxu1 %v807_v8  ;;  %v553_v11 = vld [vmem:[%s1769_s2 + $0x70] sm:$0xff]  ;;  %v552_v15 = vld [vmem:[%s1769_s2 + $0x68] sm:$0xff]  ;;  %s1136_s15 = sshll.u32 %s1407_s25, 7  ;;  %s242_s16 = scalar_lea.vmem [#allocation2], %s1111_s12 }
  0x18   : > { %1115 = vmatmul.mubr.msk.f32.vlgmr.msra.gmra.mxu0 %vm251_vm1, %v1445_v3  ;;  %1174 = vmatprep.subr.mxu0 %v570_v5  ;;  %v805_v16 = vld [vmem:[%s1770_s3 + $0xe0] sm:$0xff]  ;;  %v804_v20 = vld [vmem:[%s1770_s3 + $0xd8] sm:$0xff]  ;;  %v803_v24 = vld [vmem:[%s1770_s3 + $0xd0] sm:$0xff]  ;;  %s1048_s17 = sshll.u32 %s242_s16, 4  ;;  %s1046_s20 = scalar_lea.hbm %s1773_s6, %s1136_s15  ;;  %s1049_s17 = int_to_ptr.vmem [resolvable:$true] %s1048_s17 }
  0x19   : > { %1175 = vmatpush3.msra.mxu0 %v554_v7  ;;  %1142 = vmatpush3.msra.mxu1 %v791_v10  ;;  %v567_v17 = vld [vmem:[%s1769_s2 + $0xe0] sm:$0xff]  ;;  %v566_v21 = vld [vmem:[%s1769_s2 + $0xd8] sm:$0xff]  ;;  %v565_v25 = vld [vmem:[%s1769_s2 + $0xd0] sm:$0xff]  ;;  %s1035_s26 = scalar_lea.sflag [#allocation3], %s240_s11  ;;  %s1280_s28 = scalar_lea.vmem %s1049_s17, 128 }
  0x1a   : > { %1176 = vmatprep.subr.mxu0 %v569_v9  ;;  %1143 = vmatprep.subr.mxu1 %v806_v12  ;;  %v789_v18 = vld [vmem:[%s1770_s3 + $0x60] sm:$0xff]  ;;  %v788_v22 = vld [vmem:[%s1770_s3 + $0x58] sm:$0xff]  ;;  %v787_v26 = vld [vmem:[%s1770_s3 + $0x50] sm:$0xff]  ;;  %p1281_p11 = scmp.ne.s32.totalorder %s1049_s17, %s1280_s28  ;;  %s1286_s25 = scalar_lea.vmem %s1285_s9, 256 }
  0x1b   : > { %1177 = vmatpush3.msra.mxu0 %v553_v11  ;;  %1144 = vmatpush3.msra.mxu1 %v790_v14  ;;  %v551_v19 = vld [vmem:[%s1769_s2 + $0x60] sm:$0xff]  ;;  %v550_v23 = vld [vmem:[%s1769_s2 + $0x58] sm:$0xff]  ;;  %v549_v27 = vld [vmem:[%s1769_s2 + $0x50] sm:$0xff]  ;;  %p1287_p0 = scmp.lt.s32.totalorder %s1049_s17, %s1285_s9  ;;  %p1288_p1 = scmp.lt.s32.totalorder %s1286_s25, %s1280_s28 }
  0x1c   : > { %1178 = vmatprep.subr.mxu0 %v568_v13  ;;  %1145 = vmatprep.subr.mxu1 %v805_v16  ;;  %v802_v28 = vld [vmem:[%s1770_s3 + $0xc8] sm:$0xff]  ;;  %v801_v32 = vld [vmem:[%s1770_s3 + $0xc0] sm:$0xff]  ;;  %v800_v36 = vld [vmem:[%s1770_s3 + $0xb8] sm:$0xff]  ;;  %p1282_p12 = pnand %p1281_p11, %p1424_p5 }
  0x1d   : > { %1179 = vmatpush3.msra.mxu0 %v552_v15  ;;  %1146 = vmatpush3.msra.mxu1 %v789_v18  ;;  %v564_v29 = vld [vmem:[%s1769_s2 + $0xc8] sm:$0xff]  ;;  %v563_v33 = vld [vmem:[%s1769_s2 + $0xc0] sm:$0xff]  ;;  %v562_v37 = vld [vmem:[%s1769_s2 + $0xb8] sm:$0xff]  ;;  %p1289_p2 = por %p1288_p1, %p1287_p0 }
  0x1e   : > { %1180 = vmatprep.subr.mxu0 %v567_v17  ;;  %1147 = vmatprep.subr.mxu1 %v804_v20  ;;  %v786_v30 = vld [vmem:[%s1770_s3 + $0x48] sm:$0xff]  ;;  %v785_v34 = vld [vmem:[%s1770_s3 + $0x40] sm:$0xff]  ;;  %v784_v38 = vld [vmem:[%s1770_s3 + $0x38] sm:$0xff]  ;;  %p1283_p13 = pneg %p1282_p12 }
  0x1f   : > { %1181 = vmatpush3.msra.mxu0 %v551_v19  ;;  %1148 = vmatpush3.msra.mxu1 %v788_v22  ;;  %v548_v31 = vld [vmem:[%s1769_s2 + $0x48] sm:$0xff]  ;;  %v547_v35 = vld [vmem:[%s1769_s2 + $0x40] sm:$0xff]  ;;  %v546_v39 = vld [vmem:[%s1769_s2 + $0x38] sm:$0xff] }
  0x20   : > { %1182 = vmatprep.subr.mxu0 %v566_v21  ;;  %1149 = vmatprep.subr.mxu1 %v803_v24  ;;  %v799_v40 = vld [vmem:[%s1770_s3 + $0xb0] sm:$0xff]  ;;  %v798_v44 = vld [vmem:[%s1770_s3 + $0xa8] sm:$0xff]  ;;  %v797_v48 = vld [vmem:[%s1770_s3 + $0xa0] sm:$0xff]  ;;  %p1290_p3 = pnand %p1289_p2, %p1283_p13 }
  0x21   : > { %1183 = vmatpush3.msra.mxu0 %v550_v23  ;;  %1150 = vmatpush3.msra.mxu1 %v787_v26  ;;  %v561_v41 = vld [vmem:[%s1769_s2 + $0xb0] sm:$0xff]  ;;  %v560_v45 = vld [vmem:[%s1769_s2 + $0xa8] sm:$0xff]  ;;  %v559_v49 = vld [vmem:[%s1769_s2 + $0xa0] sm:$0xff]  ;;  %v1343_v26 = vmov 683565275  }
  0x22   : > { %1184 = vmatprep.subr.mxu0 %v565_v25  ;;  %1151 = vmatprep.subr.mxu1 %v802_v28  ;;  %v783_v42 = vld [vmem:[%s1770_s3 + $0x30] sm:$0xff]  ;;  %v782_v46 = vld [vmem:[%s1770_s3 + $0x28] sm:$0xff]  ;;  %v781_v50 = vld [vmem:[%s1770_s3 + $0x20] sm:$0xff] }
  0x23   : > { %1185 = vmatpush3.msra.mxu0 %v549_v27  ;;  %1152 = vmatpush3.msra.mxu1 %v786_v30  ;;  %v545_v43 = vld [vmem:[%s1769_s2 + $0x30] sm:$0xff]  ;;  %v544_v47 = vld [vmem:[%s1769_s2 + $0x28] sm:$0xff]  ;;  %v543_v51 = vld [vmem:[%s1769_s2 + $0x20] sm:$0xff] }
  0x24   : > { %1186 = vmatprep.subr.mxu0 %v564_v29  ;;  %1153 = vmatprep.subr.mxu1 %v801_v32  ;;  %v796_v52 = vld [vmem:[%s1770_s3 + $0x98] sm:$0xff]  ;;  %v795_v56 = vld [vmem:[%s1770_s3 + $0x90] sm:$0xff]  ;;  %v794_v60 = vld [vmem:[%s1770_s3 + $0x88] sm:$0xff]  ;;  %v1344_v29 = vmov 2475754826  }
  0x25   : > { %1187 = vmatpush3.msra.mxu0 %v548_v31  ;;  %1154 = vmatpush3.msra.mxu1 %v785_v34  ;;  %v558_v53 = vld [vmem:[%s1769_s2 + $0x98] sm:$0xff]  ;;  %v557_v57 = vld [vmem:[%s1769_s2 + $0x90] sm:$0xff]  ;;  %v556_v61 = vld [vmem:[%s1769_s2 + $0x88] sm:$0xff]  ;;  %v1345_v31 = vmov 2131351028  }
  0x26   : > { %1188 = vmatprep.subr.mxu0 %v563_v33  ;;  %1155 = vmatprep.subr.mxu1 %v800_v36  ;;  %v780_v54 = vld [vmem:[%s1770_s3 + $0x18] sm:$0xff]  ;;  %v779_v58 = vld [vmem:[%s1770_s3 + $0x10] sm:$0xff]  ;;  %v778_v62 = vld [vmem:[%s1770_s3 + $0x8] sm:$0xff]  ;;  %v1346_v33 = vmov 2102212464  }
  0x27   : > { %1189 = vmatpush3.msra.mxu0 %v547_v35  ;;  %1156 = vmatpush3.msra.mxu1 %v784_v38  ;;  %v542_v55 = vld [vmem:[%s1769_s2 + $0x18] sm:$0xff]  ;;  %v541_v59 = vld [vmem:[%s1769_s2 + $0x10] sm:$0xff]  ;;  %v540_v63 = vld [vmem:[%s1769_s2 + $0x8] sm:$0xff]  ;;  %v1347_v35 = vmov 920167782  }
  0x28   : > { %1190 = vmatprep.subr.mxu0 %v562_v37  ;;  %1157 = vmatprep.subr.mxu1 %v799_v40  ;;  %v793_v0 = vld [vmem:[%s1770_s3 + $0x80] sm:$0xff] }
  0x29   : > { %1191 = vmatpush3.msra.mxu0 %v546_v39  ;;  %1158 = vmatpush3.msra.mxu1 %v783_v42  ;;  %v555_v1 = vld [vmem:[%s1769_s2 + $0x80] sm:$0xff]  ;;  %v1348_v42 = vmov 1326507024  }
  0x2a   : > { %1192 = vmatprep.subr.mxu0 %v561_v41  ;;  %1159 = vmatprep.subr.mxu1 %v798_v44  ;;  %v777_v4 = vld [vmem:[%s1770_s3] sm:$0xff] }
  0x2b   : > { %1193 = vmatpush3.msra.mxu0 %v545_v43  ;;  %1160 = vmatpush3.msra.mxu1 %v782_v46  ;;  %v539_v5 = vld [vmem:[%s1769_s2] sm:$0xff] }
  0x2c   : > { %1194 = vmatprep.subr.mxu0 %v560_v45  ;;  %1161 = vmatprep.subr.mxu1 %v797_v48 }
  0x2d   : > { %1195 = vmatpush3.msra.mxu0 %v544_v47  ;;  %1162 = vmatpush3.msra.mxu1 %v781_v50 }
  0x2e   : > { %1196 = vmatprep.subr.mxu0 %v559_v49  ;;  %1163 = vmatprep.subr.mxu1 %v796_v52 }
  0x2f   : > { %1197 = vmatpush3.msra.mxu0 %v543_v51  ;;  %1164 = vmatpush3.msra.mxu1 %v780_v54 }
  0x30   : > { %1198 = vmatprep.subr.mxu0 %v558_v53  ;;  %1165 = vmatprep.subr.mxu1 %v795_v56 }
  0x31   : > { %1199 = vmatpush3.msra.mxu0 %v542_v55  ;;  %1166 = vmatpush3.msra.mxu1 %v779_v58 }
  0x32   : > { %1200 = vmatprep.subr.mxu0 %v557_v57  ;;  %1167 = vmatprep.subr.mxu1 %v794_v60 }
  0x33   : > { %1201 = vmatpush3.msra.mxu0 %v541_v59  ;;  %1168 = vmatpush3.msra.mxu1 %v778_v62 }
  0x34   : > { %1202 = vmatprep.subr.mxu0 %v556_v61  ;;  %1169 = vmatprep.subr.mxu1 %v793_v0 }
  0x35   : > { %1203 = vmatpush3.msra.mxu0 %v540_v63  ;;  %1170 = vmatpush3.msra.mxu1 %v777_v4 }
  0x36   : > { %1204 = vmatprep.subr.mxu0 %v555_v1  ;;  %1211 = vmatprep.subr.mxu1 %v1342_v2 }
  0x37   : > { %1205 = vmatpush3.msra.mxu0 %v539_v5 }
  0xd8   : > { %v1642_v6 = vpop.f32.mrf.mxu0 }
  0xd9   : > { %v331_v7 = vand.u32 2147483647, %v1642_v6  ;;  %v334_v8 = vand.u32 2139095040, %v1642_v6 }
  0xda   : > { %v1646_v9 = vpop.f32.mrf.mxu0 }
  0xdb   : > { %v335_v10 = vshrl.u32 %v334_v8, 23  ;;  %v338_v11 = vand.u32 8388607, %v331_v7  ;;  %v438_v12 = vand.u32 2139095040, %v1646_v9  ;;  %v435_v14 = vand.u32 2147483647, %v1646_v9 }
  0xdd   : > { %v1116_v13 = vadd.s32 4294967169, %v335_v10  ;;  %v439_v15 = vshrl.u32 %v438_v12, 23  ;;  %v339_v17 = vor.u32 8388608, %v338_v11  ;;  %v442_v19 = vand.u32 8388607, %v435_v14 }
  0xdf   : > { %v341_v16 = vadd.s32 1, %v1116_v13  ;;  %v1120_v18 = vadd.s32 4294967169, %v439_v15  ;;  %v1654_v24 = vshll.u32 %v339_v17, 8  ;;  %v443_v28 = vor.u32 8388608, %v442_v19 }
  0xe1   : > { %vm342_vm2 = vcmp.gt.s32.totalorder %v341_v16, 0  ;;  %v445_v21 = vadd.s32 1, %v1120_v18  ;;  %v483_v61 = vshll.u32 %v443_v28, 8 }
  0xe2   : > { %v343_v20 = vsel %vm342_vm2, %v341_v16, 0  ;;  %vm333_vm2 = vcmp.lt.s32.totalorder %v1642_v6, 0 }
  0xe3   : > { %v344_v22 = vshrl.u32 %v343_v20, 5  ;;  %v345_v23 = vand.u32 31, %v343_v20  ;;  %vm446_vm3 = vcmp.gt.s32.totalorder %v445_v21, 0 }
  0xe4   : > { %v447_v47 = vsel %vm446_vm3, %v445_v21, 0  ;;  %vm1701_vm3 = vcmp.le.f32.partialorder %v331_v7, 0.7853982 }
  0xe5   : > { %v346_v25 = vsub.s32 32, %v345_v23  ;;  %v348_v27 = vshll.u32 %v1343_v26, %v345_v23  ;;  %v351_v30 = vshll.u32 %v1344_v29, %v345_v23  ;;  %v354_v32 = vshll.u32 %v1345_v31, %v345_v23 }
  0xe6   : > { %v357_v34 = vshll.u32 %v1346_v33, %v345_v23  ;;  %v360_v36 = vshll.u32 %v1347_v35, %v345_v23  ;;  %vm363_vm4 = vcmp.lt.s32.totalorder %v344_v22, 1  ;;  %vm365_vm5 = vcmp.lt.s32.totalorder %v344_v22, 3 }
  0xe7   : > { %v349_v37 = vshrl.u32 %v1344_v29, %v346_v25  ;;  %v352_v38 = vshrl.u32 %v1345_v31, %v346_v25  ;;  %v355_v39 = vshrl.u32 %v1346_v33, %v346_v25  ;;  %v347_v40 = vshrl.u32 %v1343_v26, %v346_v25 }
  0xe8   : > { %v358_v41 = vshrl.u32 %v1347_v35, %v346_v25  ;;  %v361_v43 = vshrl.u32 %v1348_v42, %v346_v25  ;;  %vm366_vm6 = vcmp.lt.s32.totalorder %v344_v22, 4  ;;  %v449_v50 = vand.u32 31, %v447_v47 }
  0xe9   : > { %v350_v44 = vor.u32 %v349_v37, %v348_v27  ;;  %v353_v45 = vor.u32 %v352_v38, %v351_v30  ;;  %v356_v46 = vor.u32 %v355_v39, %v354_v32  ;;  %vm364_vm7 = vcmp.lt.s32.totalorder %v344_v22, 2 }
  0xea   : > { %v359_v48 = vor.u32 %v358_v41, %v357_v34  ;;  %v362_v49 = vor.u32 %v361_v43, %v360_v36  ;;  %v450_v58 = vsub.s32 32, %v449_v50  ;;  %v448_v1 = vshrl.u32 %v447_v47, 5 }
  0xeb   : > { %v367_v51 = vsel %vm363_vm4, %v347_v40, %v350_v44  ;;  %v368_v52 = vsel %vm366_vm6, %v356_v46, 2102212464  ;;  %v371_v53 = vsel %vm363_vm4, %v350_v44, %v353_v45  ;;  %v375_v54 = vsel %vm363_vm4, %v353_v45, %v356_v46 }
  0xec   : > { %v369_v55 = vsel %vm365_vm5, %v353_v45, %v368_v52  ;;  %v372_v56 = vsel %vm366_vm6, %v359_v48, 920167782  ;;  %v376_v57 = vsel %vm366_vm6, %v362_v49, 1326507024  ;;  %v452_v11 = vshll.u32 %v1343_v26, %v449_v50 }
  0xed   : > { %v373_v59 = vsel %vm365_vm5, %v356_v46, %v372_v56  ;;  %v377_v60 = vsel %vm365_vm5, %v359_v48, %v376_v57  ;;  %v370_v62 = vsel %vm364_vm7, %v367_v51, %v369_v55  ;;  %v453_v12 = vshrl.u32 %v1344_v29, %v450_v58 }
  0xee   : > { %v374_v63 = vsel %vm364_vm7, %v371_v53, %v373_v59  ;;  %v378_v0 = vsel %vm364_vm7, %v375_v54, %v377_v60  ;;  %v455_v13 = vshll.u32 %v1344_v29, %v449_v50  ;;  %v456_v15 = vshrl.u32 %v1345_v31, %v450_v58 }
  0xef   : > { %v1666_v4 = vmul.u32.u64.low %v1654_v24, %v378_v0  ;;  %v1667_v5 = vmul.u32.u64.high %v1654_v24, %v378_v0, %v1666_v4  ;;  %v1670_v8 = vmul.u32.u64.low %v1654_v24, %v374_v63  ;;  %v1671_v10 = vmul.u32.u64.high %v1654_v24, %v374_v63, %v1670_v8 }
  0xf0   : > { %v458_v16 = vshll.u32 %v1345_v31, %v449_v50  ;;  %v459_v17 = vshrl.u32 %v1346_v33, %v450_v58  ;;  %v461_v18 = vshll.u32 %v1346_v33, %v449_v50  ;;  %v462_v19 = vshrl.u32 %v1347_v35, %v450_v58 }
  0xf1   : > { %v454_v20 = vor.u32 %v453_v12, %v452_v11  ;;  %v457_v21 = vor.u32 %v456_v15, %v455_v13  ;;  %v464_v22 = vshll.u32 %v1347_v35, %v449_v50  ;;  %v465_v23 = vshrl.u32 %v1348_v42, %v450_v58 }
  0xf2   : > { %v386_v25 = vmul.u32 %v1654_v24, %v370_v62  ;;  %vm388_vm8 = vc.u32 %v1667_v5, %v1670_v8  ;;  %v389_v27 = vadd.s32 1, %v1671_v10  ;;  %v460_v28 = vor.u32 %v459_v17, %v458_v16 }
  0xf3   : > { %v451_v30 = vshrl.u32 %v1343_v26, %v450_v58  ;;  %v463_v29 = vor.u32 %v462_v19, %v461_v18  ;;  %v466_v32 = vor.u32 %v465_v23, %v464_v22  ;;  %vm467_vm9 = vcmp.lt.s32.totalorder %v448_v1, 1 }
  0xf4   : > { %v390_v31 = vsel %vm388_vm8, %v389_v27, %v1671_v10  ;;  %vm469_vm10 = vcmp.lt.s32.totalorder %v448_v1, 3  ;;  %vm470_vm11 = vcmp.lt.s32.totalorder %v448_v1, 4  ;;  %v475_v33 = vsel %vm467_vm9, %v454_v20, %v457_v21 }
  0xf5   : > { %v391_v34 = vadd.s32 %v390_v31, %v386_v25  ;;  %v472_v35 = vsel %vm470_vm11, %v460_v28, 2102212464  ;;  %v476_v36 = vsel %vm470_vm11, %v463_v29, 920167782  ;;  %v479_v24 = vsel %vm467_vm9, %v457_v21, %v460_v28 }
  0xf6   : > { %vm468_vm12 = vcmp.lt.s32.totalorder %v448_v1, 2  ;;  %v471_v37 = vsel %vm467_vm9, %v451_v30, %v454_v20  ;;  %v477_v38 = vsel %vm469_vm10, %v460_v28, %v476_v36  ;;  %v480_v39 = vsel %vm470_vm11, %v466_v32, 1326507024 }
  0xf7   : > { %v392_v40 = vadd.s32 536870912, %v391_v34  ;;  %v473_v41 = vsel %vm469_vm10, %v457_v21, %v472_v35  ;;  %v478_v42 = vsel %vm468_vm12, %v475_v33, %v477_v38  ;;  %v481_v26 = vsel %vm469_vm10, %v463_v29, %v480_v39 }
  0xf8   : > { %v482_v43 = vsel %vm468_vm12, %v479_v24, %v481_v26  ;;  %v1681_v44 = vmul.u32.u64.low %v483_v61, %v478_v42  ;;  %v1682_v45 = vmul.u32.u64.high %v483_v61, %v478_v42, %v1681_v44  ;;  %v474_v49 = vsel %vm468_vm12, %v471_v37, %v473_v41 }
  0xf9   : > { %v1684_v46 = vshrl.u32 %v392_v40, 30  ;;  %v1686_v47 = vmul.u32.u64.low %v483_v61, %v482_v43  ;;  %v1687_v48 = vmul.u32.u64.high %v483_v61, %v482_v43, %v1686_v47  ;;  %v490_v53 = vmul.u32 %v483_v61, %v474_v49 }
  0xfa   : > { %v493_v51 = vadd.s32 1, %v1682_v45  ;;  %v387_v4 = vadd.s32 %v1670_v8, %v1667_v5  ;;  %vm437_vm4 = vcmp.lt.s32.totalorder %v1646_v9, 0  ;;  %vm436_vm5 = vcmp.le.f32.partialorder %v435_v14, 0.7853982 }
  0xfb   : > { %v394_v50 = vshll.u32 %v1684_v46, 30  ;;  %vm492_vm13 = vc.u32 %v1687_v48, %v1681_v44  ;;  %v491_v28 = vadd.s32 %v1681_v44, %v1687_v48  ;;  %v417_v40 = vsub.s32 4, %v1684_v46 }
  0xfc   : > { %v494_v54 = vsel %vm492_vm13, %v493_v51, %v1682_v45 }
  0xfd   : > { %v395_v52 = vsub.s32 %v391_v34, %v394_v50  ;;  %v495_v56 = vadd.s32 %v494_v54, %v490_v53  ;;  %v418_v7 = vsel %vm333_vm2, %v417_v40, %v1684_v46 }
  0xfe   : > { %v420_v47 = vsel %vm1701_vm3, 0, %v418_v7 }
  0xff   : > { %v397_v55 = vsub.s32 0, %v395_v52  ;;  %v496_v58 = vadd.s32 536870912, %v495_v56  ;;  %v424_v49 = vadd.s32 3, %v420_v47  ;;  %v664_v53 = vand.u32 3, %v420_v47 }
 0x101   : > { %v1117_v57 = vmin.u32 %v397_v55, %v395_v52  ;;  %v497_v60 = vshrl.u32 %v496_v58, 30  ;;  %v425_v54 = vand.u32 3, %v424_v49  ;;  %vm665_vm6 = vcmp.lt.s32.totalorder %v664_v53, 2 }
 0x102   : > { %vm666_vm7 = vcmp.eq.s32.totalorder %v664_v53, 0  ;;  %vm669_vm8 = vcmp.eq.s32.totalorder %v664_v53, 2 }
 0x103   : > { %v399_v59 = vclz %v1117_v57  ;;  %v498_v63 = vshll.u32 %v497_v60, 30  ;;  %v521_v26 = vsub.s32 4, %v497_v60  ;;  %vm426_vm9 = vcmp.lt.s32.totalorder %v425_v54, 2 }
 0x104   : > { %vm427_vm11 = vcmp.eq.s32.totalorder %v425_v54, 0  ;;  %vm430_vm12 = vcmp.eq.s32.totalorder %v425_v54, 2 }
 0x105   : > { %v1118_v62 = vadd.s32 4294967294, %v399_v59  ;;  %v499_v0 = vsub.s32 %v495_v56, %v498_v63  ;;  %v522_v45 = vsel %vm437_vm4, %v521_v26, %v497_v60 }
 0x106   : > { %v524_v48 = vsel %vm436_vm5, 0, %v522_v45 }
 0x107   : > { %vm1119_vm14 = vcmp.lt.s32.totalorder %v1118_v62, 0  ;;  %v501_v11 = vsub.s32 0, %v499_v0  ;;  %v767_v46 = vand.u32 3, %v524_v48 }
 0x108   : > { %v402_v1 = vsel %vm1119_vm14, 0, %v1118_v62 }
 0x109   : > { %v403_v10 = vsub.s32 32, %v402_v1  ;;  %v407_v61 = vsub.s32 4294967266, %v402_v1  ;;  %v404_v12 = vshll.u32 %v395_v52, %v402_v1  ;;  %v1121_v16 = vmin.u32 %v501_v11, %v499_v0 }
 0x10a   : > { %v528_v52 = vadd.s32 3, %v524_v48  ;;  %vm768_vm10 = vcmp.lt.s32.totalorder %v767_v46, 2  ;;  %vm769_vm13 = vcmp.eq.s32.totalorder %v767_v46, 0  ;;  %vm772_vm14 = vcmp.eq.s32.totalorder %v767_v46, 2 }
 0x10b   : > { %v405_v13 = vshrl.u32 %v387_v4, %v403_v10  ;;  %v408_v15 = vadd.s32 127, %v407_v61  ;;  %v503_v19 = vclz %v1121_v16 }
 0x10c   : > { %v529_v14 = vand.u32 3, %v528_v52 }
 0x10d   : > { %v406_v17 = vor.u32 %v405_v13, %v404_v12  ;;  %v409_v18 = vshll.u32 %v408_v15, 23  ;;  %v1122_v21 = vadd.s32 4294967294, %v503_v19  ;;  %v949_v19 = vld [vmem:[%s1771_s4] sm:$0xf] }
 0x10f   : > { %v410_v20 = vor.u32 4788187, %v409_v18  ;;  %v413_v23 = vcvt.s32.f32 %v406_v17  ;;  %vm1123_vm15 = vcmp.lt.s32.totalorder %v1122_v21, 0 }
 0x110   : > { %v506_v25 = vsel %vm1123_vm15, 0, %v1122_v21  ;;  %vm534_vm15 = vcmp.eq.s32.totalorder %v529_v14, 2 }
 0x111   : > { %v411_v22 = vand.u32 2147483647, %v410_v20  ;;  %v507_v5 = vsub.s32 32, %v506_v25  ;;  %v511_v8 = vsub.s32 4294967266, %v506_v25  ;;  %v508_v29 = vshll.u32 %v499_v0, %v506_v25 }
 0x113   : > { %v414_v27 = vmul.f32 %v413_v23, %v411_v22  ;;  %v509_v32 = vshrl.u32 %v491_v28, %v507_v5  ;;  %v512_v31 = vadd.s32 127, %v511_v8  ;;  %v1134_v8 = vld [vmem:[%s1772_s5] ss:$0 sm:$0xff] }
 0x115   : > { %v415_v30 = vxor.u32 2147483648, %v414_v27  ;;  %v510_v34 = vor.u32 %v509_v32, %v508_v29  ;;  %v513_v35 = vshll.u32 %v512_v31, 23 }
 0x117   : > { %v416_v33 = vsel %vm333_vm2, %v415_v30, %v414_v27  ;;  %v514_v37 = vor.u32 4788187, %v513_v35  ;;  %v517_v39 = vcvt.s32.f32 %v510_v34  ;;  %vm530_vm2 = vcmp.lt.s32.totalorder %v529_v14, 2 }
 0x118   : > { %v419_v24 = vsel %vm1701_vm3, %v1642_v6, %v416_v33  ;;  %vm531_vm3 = vcmp.eq.s32.totalorder %v529_v14, 0 }
 0x119   : > { %v515_v38 = vand.u32 2147483647, %v514_v37  ;;  %1272 = vcosq.f32 %v419_v24 }
 0x11a   : > { %1274 = vsinq.f32 %v419_v24 }
 0x11b   : > { %v518_v41 = vmul.f32 %v517_v39, %v515_v38 }
 0x11d   : > { %v519_v42 = vxor.u32 2147483648, %v518_v41 }
 0x11f   : > { %v520_v43 = vsel %vm437_vm4, %v519_v42, %v518_v41  ;;  %vm527_vm4 = vweird.f32 %v1646_v9 }
 0x120   : > { %v523_v44 = vsel %vm436_vm5, %v1646_v9, %v520_v43  ;;  %vm423_vm5 = vweird.f32 %v1642_v6 }
 0x121   : > { %1276 = vcosq.f32 %v523_v44 }
 0x122   : > { %1278 = vsinq.f32 %v523_v44 }
 0x126   : > { %v1273_v50 = vpop.eup %1272 }
 0x127   : > { %v1275_v51 = vpop.eup %1274  ;;  %v431_v55 = vxor.u32 2147483648, %v1273_v50 }
 0x128   : > { %v428_v56 = vxor.u32 2147483648, %v1275_v51 }
 0x129   : > { %v671_v58 = vsel %vm669_vm8, %v431_v55, %v1275_v51  ;;  %v432_v0 = vsel %vm430_vm12, %v431_v55, %v1275_v51 }
 0x12a   : > { %v668_v62 = vsel %vm666_vm7, %v1273_v50, %v428_v56  ;;  %v429_v63 = vsel %vm427_vm11, %v1273_v50, %v428_v56 }
 0x12b   : > { %v672_v12 = vsel %vm665_vm6, %v668_v62, %v671_v58  ;;  %v433_v13 = vsel %vm426_vm9, %v429_v63, %v432_v0  ;;  %vm1349_vm6 = vmmov 0  }
 0x12c   : > { %v673_v20 = vsel %vm423_vm5, nan, %v672_v12  ;;  %v434_v21 = vsel %vm423_vm5, nan, %v433_v13 }
 0x12e   : > { %v1277_v57 = vpop.eup %1276 }
 0x12f   : > { %v1279_v59 = vpop.eup %1278  ;;  %v535_v60 = vxor.u32 2147483648, %v1277_v57 }
 0x130   : > { %v532_v1 = vxor.u32 2147483648, %v1279_v59 }
 0x131   : > { %v774_v4 = vsel %vm772_vm14, %v535_v60, %v1279_v59  ;;  %v536_v10 = vsel %vm534_vm15, %v535_v60, %v1279_v59 }
 0x132   : > { %v771_v61 = vsel %vm769_vm13, %v1277_v57, %v532_v1  ;;  %v533_v11 = vsel %vm531_vm3, %v1277_v57, %v532_v1 }
 0x133   : > { %v775_v15 = vsel %vm768_vm10, %v771_v61, %v774_v4  ;;  %v537_v16 = vsel %vm530_vm2, %v533_v11, %v536_v10 }
 0x134   : > { %v776_v17 = vsel %vm527_vm4, nan, %v775_v15  ;;  %v538_v18 = vsel %vm527_vm4, nan, %v537_v16 }
 0x135   : > { %873 = vmatprep.mubr.f32.mxu1 %v776_v17  ;;  %943 = vmatprep.mubr.f32.mxu0 %v538_v18 }
 0x136   : > { %874 = vmatmul.mubr.f32.vlgmr.msra.gmra.mxu1 %v673_v20  ;;  %944 = vmatmul.mubr.f32.vlgmr.msra.gmra.mxu0 %v434_v21 }
 0x137   : > { %1212 = vmatpush3.msk.msra.mxu1 %vm255_vm0, %v949_v19  ;;  %1213 = vmatprep.mubr.msk.f32.mxu1 %vm1349_vm6, %v1342_v2  ;;  %vm1032_vm0 = vcmask 588800  }
 0x13a   : > { %1214 = vmatmul.mubr.msk.f32.vlgmr.msra.gmra.mxu1 %vm251_vm1, %v1445_v3 }
 0x1f6   : > { %v1171_v6 = vpop.f32.mrf.mxu1  ;;  %v1206_v9 = vpop.f32.mrf.mxu0 }
 0x1f8   : > { %v1172_v22 = vpop.f32.mrf.mxu1  ;;  %v1207_v23 = vpop.f32.mrf.mxu0 }
 0x1f9   : > { %v1173_v25 = vadd.f32 %v1172_v22, %v1171_v6  ;;  %v1208_v27 = vadd.f32 %v1207_v23, %v1206_v9 }
 0x1fa   : > { %v1019_v28 = vpop.f32.mrf.mxu1 }
 0x1fb   : > { %v946_v5 = vadd.f32 %v1208_v27, %v1173_v25 }
 0x1fc   : > { %v1215_v30 = vpop.f32.mrf.mxu1 }
 0x1fd   : > { %v1023_v2 = vadd.f32 %v1019_v28, %v946_v5 }
 0x1ff   : > { %v1031_v3 = vadd.f32 %v1134_v8, %v1023_v2 }
 0x201   : > { %1033 = vst.msk [vmem:[%s242_s16] sm:$0xff] %vm1032_vm0, %v1031_v3 }
 0x202   : > { %1293 = shalt.err (!%p1290_p3)
}
 0x203   : > { %s1294_s10 = scalar_lea.hbm %s1046_s20, 128  ;;  %s1298_s13 = scalar_lea.hbm %s1773_s6, 256 }
 0x204   : > { %p1295_p4 = scmp.ne.s32.totalorder %s1046_s20, %s1294_s10  ;;  %p1299_p9 = scmp.lt.s32.totalorder %s1046_s20, %s1773_s6 }
 0x205   : > { %p1300_p10 = scmp.lt.s32.totalorder %s1298_s13, %s1294_s10 }
 0x206   : > { %p1296_p7 = pnand %p1295_p4, %p1424_p5 }
 0x207   : > { %p1301_p11 = por %p1300_p10, %p1299_p9 }
 0x208   : > { %p1297_p8 = pneg %p1296_p7 }
 0x20a   : > { %p1302_p12 = pnand %p1301_p11, %p1297_p8 }
 0x20c   : > { %1305 = shalt.err (!%p1302_p12)
}
 0x20d   : > { %1224 = dma.vmem_to_hbm [thread:$0]  (%p1424_p5), %s1049_s17, 128, %s1046_s20, %s1035_s26  }
 0x20e PF: > { %p1230_p13 = scmp.ge.s32.totalorder %s1340_s24, 2  ;;  %s1060_s16 = sand.u32 1, %s1328_s21  }
 0x20f   : > { %s1061_s18 = scalar_lea.sflag [#allocation3], %s1060_s16 }
 0x210   : > { %p1227_p0 = pnand %p1230_p13, %p1428_p6 }
 0x212   : > { %p1228_p1 = pneg %p1227_p0 }
 0x214   : > { %1323 = dma.done.wait (%p1228_p1), %s1061_s18, 128  }
 0x215   : > { %1325 = vsyncadd (%p1228_p1), %s1061_s18, 4294967168  ;;  %p16_p2 = scmp.ge.s32.totalorder %s1411_s27, 4   ;;  %s1778_s21 = smov %s1332_s22 }
 0x216   : > { %s1779_s22 = smov %s1336_s23  ;;  %s1780_s23 = smov %s1422_s30 }
 0x217   : > { %s1781_s24 = smov %s1411_s27  ;;  %18 = sbr.rel (!%p16_p2) target bundleno = 3 (0x3), region = 79 }
 0x21c   :  { %1066 = vsyncpa [#allocation3], 1 }
 0x21d   :  { %1068 = vsyncpa [#allocation3 + $0x1], 1 }

</bundles_post_ra>
